<compile_context>
chip_gen: v7x
topology: tpu7x:2x2x1
jax: 0.10.0
libtpu: 0.0.40
codegen_flags: <defaults>
</compile_context>

<pallas_src>
import jax
import jax.numpy as jnp
from jax.experimental import pallas as pl
from jax.experimental.pallas import tpu as pltpu


def vga_kernel(img_ref, emb_ref,
               w_img_ref, b_img_ref,
               w_ih_ref, w_hh_ref, b_lstm_ref,
               w_txt_ref, b_txt_ref,
               w_ans_ref, b_ans_ref,
               scores_ref):
    f32 = jnp.float32
    T = emb_ref.shape[0]          # sequence length (static)
    H = w_hh_ref.shape[0]         # hidden dim (static)

    # ---- image branch: x.sum(2).sum(2) as a cross-lane reduce, then project --
    # img_ref is (B, C, H*W); reduce the lane (spatial) axis -> (B, C).
    img_sum = jnp.sum(img_ref[...], axis=2)                   # (B, C)
    img_mapped = (jnp.dot(img_sum, w_img_ref[...],
                          preferred_element_type=f32)
                  + b_img_ref[...])                           # (B, D_map)

    # ---- question branch: LSTM over T tokens (batch=1, zero init state) -----
    # TODO(synk): PyTorch's LSTMModel persists self.hidden across forward
    # calls; here we always use the zero initial state (matches the module's
    # first forward call).
    # Hoisted input projection: one (T, D_txt) @ (D_txt, 4H) matmul,
    # bias (b_ih + b_hh) added once. Gate packing order: i, f, o, g
    # (PyTorch packs i, f, g, o — repacked at init; a column permutation would
    # be needed when importing real PyTorch weights).
    x_proj = (jnp.dot(emb_ref[...], w_ih_ref[...],
                      preferred_element_type=f32)
              + b_lstm_ref[...])                              # (T, 4H)
    w_hh = w_hh_ref[...]                                      # (H, 4H), load once
    # TODO(synk): W_hh could be staged in the MXU once via pltpu.matmul_push_rhs
    # and driven per step; skipped pending verification that Mosaic doesn't
    # already hoist the RHS push for the unrolled identical-RHS dots.

    h = jnp.zeros((1, H), f32)
    c = jnp.zeros((1, H), f32)
    for t in range(T):                                        # static unroll (T=8)
        gates = x_proj[t:t + 1, :] + jnp.dot(h, w_hh,
                                             preferred_element_type=f32)  # (1, 4H)
        ifo = jax.nn.sigmoid(gates[:, 0:3 * H])               # one EUP pass, (1, 3H)
        i_g = ifo[:, 0 * H:1 * H]
        f_g = ifo[:, 1 * H:2 * H]
        o_g = ifo[:, 2 * H:3 * H]
        g_g = jnp.tanh(gates[:, 3 * H:4 * H])
        c = f_g * c + i_g * g_g
        h = o_g * jnp.tanh(c)

    # ---- text branch: Linear(D_hidden -> D_map) -----------------------------
    txt_mapped = (jnp.dot(h, w_txt_ref[...], preferred_element_type=f32)
                  + b_txt_ref[...])                           # (1, D_map)

    # ---- fuse: broadcasted mul, L2 normalize (dim=1), Linear(D_map -> A_pad) -
    prod = txt_mapped * img_mapped                            # (B, D_map)
    sq = jnp.sum(prod * prod, axis=1, keepdims=True)          # (B, 1)
    # exact rsqrt on EUP; max(sq, 1e-24) == F.normalize's max(norm, 1e-12)
    inv_norm = jax.lax.rsqrt(jnp.maximum(sq, 1e-24))
    normalized = prod * inv_norm
    # Lane-dense (B, A_pad) store; padding columns carry zero weight/bias.
    scores_ref[...] = (jnp.dot(normalized, w_ans_ref[...],
                               preferred_element_type=f32)
                       + b_ans_ref[...])                      # (B, A_pad)


def _round_up(n, m):
    return ((n + m - 1) // m) * m


def init_params(key, D_img, D_txt, D_map, D_hidden, vocab_size, ans_size):
    ks = jax.random.split(key, 11)

    def lin(k, fan_in, shape):
        bound = 1.0 / jnp.sqrt(jnp.float32(fan_in))
        return jax.random.uniform(k, shape, jnp.float32, -bound, bound)

    # LSTM biases: two independent draws summed (matches PyTorch b_ih + b_hh).
    b_ih = lin(ks[5], D_hidden, (1, 4 * D_hidden))
    b_hh = lin(ks[10], D_hidden, (1, 4 * D_hidden))

    w_ans = lin(ks[8], D_map, (D_map, ans_size))
    b_ans = lin(ks[9], D_map, (1, ans_size))
    A_pad = _round_up(ans_size, 128)
    w_ans_pad = jnp.pad(w_ans, ((0, 0), (0, A_pad - ans_size)))
    b_ans_pad = jnp.pad(b_ans, ((0, 0), (0, A_pad - ans_size)))

    return dict(
        # frozen question word embeddings (Embedding weight)
        emb_table=jax.random.normal(ks[0], (vocab_size, D_txt), jnp.float32),
        # squeeze_image_to_map_d : Linear(D_img, D_map), stored (in, out)
        w_img=lin(ks[1], D_img, (D_img, D_map)),
        b_img=lin(ks[2], D_img, (1, D_map)),
        # LSTM(D_txt, D_hidden): gate-fused weights, packing order i, f, o, g
        w_ih=lin(ks[3], D_hidden, (D_txt, 4 * D_hidden)),
        w_hh=lin(ks[4], D_hidden, (D_hidden, 4 * D_hidden)),
        b_lstm=b_ih + b_hh,                                   # (1, 4H)
        # squeeze_wordvec_to_map_d : Linear(D_hidden, D_map)
        w_txt=lin(ks[6], D_hidden, (D_hidden, D_map)),
        b_txt=lin(ks[7], D_hidden, (1, D_map)),
        # map_to_answer_choices : Linear(D_map, ans_size), plus lane-dense pad
        w_ans=w_ans,
        b_ans=b_ans,
        w_ans_pad=w_ans_pad,
        b_ans_pad=b_ans_pad,
    )


def _cost_estimate(B, C, HW, T, D_txt, H, D_map, A_pad):
    flops = (B * C * HW                      # spatial-sum adds
             + 2 * B * C * D_map             # image projection
             + 2 * T * D_txt * 4 * H         # hoisted X @ W_ih
             + T * (2 * H * 4 * H + 12 * H)  # recurrence matmul + elementwise
             + 2 * H * D_map                 # text projection
             + 8 * B * D_map                 # mul / square / reduce / normalize
             + 2 * B * D_map * A_pad)        # answer head
    transcendentals = T * (3 * H + 2 * H) + B   # sigmoid(3H)+tanh(H)+tanh(c), rsqrt
    bytes_accessed = 4 * (B * C * HW + T * D_txt
                          + C * D_map + D_map
                          + D_txt * 4 * H + H * 4 * H + 4 * H
                          + H * D_map + D_map
                          + D_map * A_pad + A_pad
                          + B * A_pad)
    return pl.CostEstimate(flops=flops, transcendentals=transcendentals,
                           bytes_accessed=bytes_accessed)


@jax.jit
def vga_forward(image_feat, token_ids, params):
    B, C, Hs, Ws = image_feat.shape
    T = token_ids.shape[1]
    D_txt = params["w_ih"].shape[0]
    H = params["w_hh"].shape[0]
    D_map = params["w_txt"].shape[1]
    A = params["b_ans"].shape[1]
    A_pad = params["b_ans_pad"].shape[1]

    # Embedding lookup (gather) is glue, done in plain JAX outside the kernel.
    embeds = jnp.take(params["emb_table"], token_ids[0], axis=0)   # (T, D_txt)
    # Pure view reshape: (B, C, H, W) -> (B, C, H*W); spatial sum happens in-kernel.
    img3d = image_feat.reshape(B, C, Hs * Ws)

    inputs = (img3d, embeds,
              params["w_img"], params["b_img"],
              params["w_ih"], params["w_hh"], params["b_lstm"],
              params["w_txt"], params["b_txt"],
              params["w_ans_pad"], params["b_ans_pad"])

    scores_pad = pl.pallas_call(
        vga_kernel,
        out_shape=jax.ShapeDtypeStruct((B, A_pad), jnp.float32),
        in_specs=[pl.BlockSpec(memory_space=pltpu.MemorySpace.VMEM)] * len(inputs),
        out_specs=pl.BlockSpec(memory_space=pltpu.MemorySpace.VMEM),
        cost_estimate=_cost_estimate(B, C, Hs * Ws, T, D_txt, H, D_map, A_pad),
    )(*inputs)
    return scores_pad[:, :A]


def vga_reference(image_feat, token_ids, params):
    """Pure-JAX reference mirroring the PyTorch forward (same i,f,o,g packing)."""
    embeds = params["emb_table"][token_ids[0]]
    img_mapped = image_feat.sum(axis=(2, 3)) @ params["w_img"] + params["b_img"]
    H = params["w_txt"].shape[0]
    h = jnp.zeros((1, H), jnp.float32)
    c = jnp.zeros((1, H), jnp.float32)
    for t in range(embeds.shape[0]):
        x = embeds[t:t + 1]
        gates = x @ params["w_ih"] + h @ params["w_hh"] + params["b_lstm"]
        i_g = jax.nn.sigmoid(gates[:, 0 * H:1 * H])
        f_g = jax.nn.sigmoid(gates[:, 1 * H:2 * H])
        o_g = jax.nn.sigmoid(gates[:, 2 * H:3 * H])
        g_g = jnp.tanh(gates[:, 3 * H:4 * H])
        c = f_g * c + i_g * g_g
        h = o_g * jnp.tanh(c)
    txt_mapped = h @ params["w_txt"] + params["b_txt"]
    prod = txt_mapped * img_mapped
    norm = jnp.maximum(jnp.linalg.norm(prod, axis=1, keepdims=True), 1e-12)
    return (prod / norm) @ params["w_ans"] + params["b_ans"]


if __name__ == "__main__":
    key = jax.random.PRNGKey(0)
    k_img, k_tok, k_param = jax.random.split(key, 3)

    # Small shapes consistent with the module's forward:
    B, D_img, Hs, Ws = 2, 8, 8, 8        # image_feat: (B, D_img, H, W)
    D_txt, D_hidden, D_map = 16, 32, 32
    vocab, ans_choices, T = 50, 16, 8    # token_sequence_tensor: (1, T)

    params = init_params(k_param, D_img, D_txt, D_map, D_hidden,
                         vocab, ans_choices)
    image_feat = jax.random.normal(k_img, (B, D_img, Hs, Ws), jnp.float32)
    token_ids = jax.random.randint(k_tok, (1, T), 0, vocab)

    scores = vga_forward(image_feat, token_ids, params)
    jax.block_until_ready(scores)

    ref = vga_reference(image_feat, token_ids, params)
    assert scores.shape == (B, ans_choices)
    assert jnp.allclose(scores, ref, atol=1e-4, rtol=1e-4)
    print("KERNEL_OK")
</pallas_src>

<mosaic_0001>
module attributes {stable_mosaic.version = 11 : i64} {
  func.func @vga_kernel(%arg0: memref<2x8x64xf32, #tpu.memory_space<vmem>>, %arg1: memref<8x16xf32, #tpu.memory_space<vmem>>, %arg2: memref<8x32xf32, #tpu.memory_space<vmem>>, %arg3: memref<1x32xf32, #tpu.memory_space<vmem>>, %arg4: memref<16x128xf32, #tpu.memory_space<vmem>>, %arg5: memref<32x128xf32, #tpu.memory_space<vmem>>, %arg6: memref<1x128xf32, #tpu.memory_space<vmem>>, %arg7: memref<32x32xf32, #tpu.memory_space<vmem>>, %arg8: memref<1x32xf32, #tpu.memory_space<vmem>>, %arg9: memref<32x128xf32, #tpu.memory_space<vmem>>, %arg10: memref<1x128xf32, #tpu.memory_space<vmem>>, %arg11: memref<2x128xf32, #tpu.memory_space<vmem>>) attributes {dimension_semantics = [], scalar_prefetch = 0 : i64, scratch_operands = 0 : i64, tpu.core_type = #tpu.core_type<tc>} {
    %c0 = arith.constant 0 : index
    %c0_0 = arith.constant 0 : index
    %c0_1 = arith.constant 0 : index
    %0 = vector.load %arg0[%c0, %c0_0, %c0_1] : memref<2x8x64xf32, #tpu.memory_space<vmem>>, vector<2x8x64xf32>
    %cst = arith.constant dense<0.000000e+00> : vector<2x8xf32>
    %1 = vector.multi_reduction <add>, %0, %cst [2] : vector<2x8x64xf32> to vector<2x8xf32>
    %c0_2 = arith.constant 0 : index
    %c0_3 = arith.constant 0 : index
    %2 = vector.load %arg2[%c0_2, %c0_3] : memref<8x32xf32, #tpu.memory_space<vmem>>, vector<8x32xf32>
    %cst_4 = arith.constant dense<0.000000e+00> : vector<2x32xf32>
    %3 = tpu.matmul %1, %2, %cst_4 {dimension_numbers = #tpu.dot_dimension_numbers<[1], [0], [0], [1], [0, 0, 1, 1], [], []>} : vector<2x8xf32>, vector<8x32xf32>, vector<2x32xf32> -> vector<2x32xf32>
    %c0_5 = arith.constant 0 : index
    %c0_6 = arith.constant 0 : index
    %4 = vector.load %arg3[%c0_5, %c0_6] : memref<1x32xf32, #tpu.memory_space<vmem>>, vector<1x32xf32>
    %5 = vector.broadcast %4 : vector<1x32xf32> to vector<2x32xf32>
    %6 = arith.addf %3, %5 : vector<2x32xf32>
    %c0_7 = arith.constant 0 : index
    %c0_8 = arith.constant 0 : index
    %7 = vector.load %arg1[%c0_7, %c0_8] : memref<8x16xf32, #tpu.memory_space<vmem>>, vector<8x16xf32>
    %c0_9 = arith.constant 0 : index
    %c0_10 = arith.constant 0 : index
    %8 = vector.load %arg4[%c0_9, %c0_10] : memref<16x128xf32, #tpu.memory_space<vmem>>, vector<16x128xf32>
    %cst_11 = arith.constant dense<0.000000e+00> : vector<8x128xf32>
    %9 = tpu.matmul %7, %8, %cst_11 {dimension_numbers = #tpu.dot_dimension_numbers<[1], [0], [0], [1], [0, 0, 1, 1], [], []>} : vector<8x16xf32>, vector<16x128xf32>, vector<8x128xf32> -> vector<8x128xf32>
    %c0_12 = arith.constant 0 : index
    %c0_13 = arith.constant 0 : index
    %10 = vector.load %arg6[%c0_12, %c0_13] : memref<1x128xf32, #tpu.memory_space<vmem>>, vector<1x128xf32>
    %11 = vector.broadcast %10 : vector<1x128xf32> to vector<8x128xf32>
    %12 = arith.addf %9, %11 : vector<8x128xf32>
    %c0_14 = arith.constant 0 : index
    %c0_15 = arith.constant 0 : index
    %13 = vector.load %arg5[%c0_14, %c0_15] : memref<32x128xf32, #tpu.memory_space<vmem>>, vector<32x128xf32>
    %cst_16 = arith.constant 0.000000e+00 : f32
    %14 = vector.broadcast %cst_16 : f32 to vector<1x32xf32>
    %cst_17 = arith.constant 0.000000e+00 : f32
    %15 = vector.broadcast %cst_17 : f32 to vector<1x32xf32>
    %16 = vector.extract_strided_slice %12 {offsets = [0, 0], sizes = [1, 128], strides = [1, 1]} : vector<8x128xf32> to vector<1x128xf32>
    %cst_18 = arith.constant dense<0.000000e+00> : vector<1x128xf32>
    %17 = tpu.matmul %14, %13, %cst_18 {dimension_numbers = #tpu.dot_dimension_numbers<[1], [0], [0], [1], [0, 0, 1, 1], [], []>} : vector<1x32xf32>, vector<32x128xf32>, vector<1x128xf32> -> vector<1x128xf32>
    %18 = arith.addf %16, %17 : vector<1x128xf32>
    %19 = vector.extract_strided_slice %18 {offsets = [0, 0], sizes = [1, 96], strides = [1, 1]} : vector<1x128xf32> to vector<1x96xf32>
    %20 = arith.negf %19 : vector<1x96xf32>
    %21 = math.exp %20 : vector<1x96xf32>
    %cst_19 = arith.constant 1.000000e+00 : f32
    %22 = vector.broadcast %cst_19 : f32 to vector<1x96xf32>
    %23 = arith.addf %22, %21 : vector<1x96xf32>
    %24 = arith.divf %22, %23 : vector<1x96xf32>
    %25 = vector.extract_strided_slice %24 {offsets = [0, 0], sizes = [1, 32], strides = [1, 1]} : vector<1x96xf32> to vector<1x32xf32>
    %26 = vector.extract_strided_slice %24 {offsets = [0, 32], sizes = [1, 32], strides = [1, 1]} : vector<1x96xf32> to vector<1x32xf32>
    %27 = vector.extract_strided_slice %24 {offsets = [0, 64], sizes = [1, 32], strides = [1, 1]} : vector<1x96xf32> to vector<1x32xf32>
    %28 = vector.extract_strided_slice %18 {offsets = [0, 96], sizes = [1, 32], strides = [1, 1]} : vector<1x128xf32> to vector<1x32xf32>
    %29 = math.tanh %28 : vector<1x32xf32>
    %30 = arith.mulf %26, %15 : vector<1x32xf32>
    %31 = arith.mulf %25, %29 : vector<1x32xf32>
    %32 = arith.addf %30, %31 : vector<1x32xf32>
    %33 = math.tanh %32 : vector<1x32xf32>
    %34 = arith.mulf %27, %33 : vector<1x32xf32>
    %35 = vector.extract_strided_slice %12 {offsets = [1, 0], sizes = [1, 128], strides = [1, 1]} : vector<8x128xf32> to vector<1x128xf32>
    %cst_20 = arith.constant dense<0.000000e+00> : vector<1x128xf32>
    %36 = tpu.matmul %34, %13, %cst_20 {dimension_numbers = #tpu.dot_dimension_numbers<[1], [0], [0], [1], [0, 0, 1, 1], [], []>} : vector<1x32xf32>, vector<32x128xf32>, vector<1x128xf32> -> vector<1x128xf32>
    %37 = arith.addf %35, %36 : vector<1x128xf32>
    %38 = vector.extract_strided_slice %37 {offsets = [0, 0], sizes = [1, 96], strides = [1, 1]} : vector<1x128xf32> to vector<1x96xf32>
    %39 = arith.negf %38 : vector<1x96xf32>
    %40 = math.exp %39 : vector<1x96xf32>
    %cst_21 = arith.constant 1.000000e+00 : f32
    %41 = vector.broadcast %cst_21 : f32 to vector<1x96xf32>
    %42 = arith.addf %41, %40 : vector<1x96xf32>
    %43 = arith.divf %41, %42 : vector<1x96xf32>
    %44 = vector.extract_strided_slice %43 {offsets = [0, 0], sizes = [1, 32], strides = [1, 1]} : vector<1x96xf32> to vector<1x32xf32>
    %45 = vector.extract_strided_slice %43 {offsets = [0, 32], sizes = [1, 32], strides = [1, 1]} : vector<1x96xf32> to vector<1x32xf32>
    %46 = vector.extract_strided_slice %43 {offsets = [0, 64], sizes = [1, 32], strides = [1, 1]} : vector<1x96xf32> to vector<1x32xf32>
    %47 = vector.extract_strided_slice %37 {offsets = [0, 96], sizes = [1, 32], strides = [1, 1]} : vector<1x128xf32> to vector<1x32xf32>
    %48 = math.tanh %47 : vector<1x32xf32>
    %49 = arith.mulf %45, %32 : vector<1x32xf32>
    %50 = arith.mulf %44, %48 : vector<1x32xf32>
    %51 = arith.addf %49, %50 : vector<1x32xf32>
    %52 = math.tanh %51 : vector<1x32xf32>
    %53 = arith.mulf %46, %52 : vector<1x32xf32>
    %54 = vector.extract_strided_slice %12 {offsets = [2, 0], sizes = [1, 128], strides = [1, 1]} : vector<8x128xf32> to vector<1x128xf32>
    %cst_22 = arith.constant dense<0.000000e+00> : vector<1x128xf32>
    %55 = tpu.matmul %53, %13, %cst_22 {dimension_numbers = #tpu.dot_dimension_numbers<[1], [0], [0], [1], [0, 0, 1, 1], [], []>} : vector<1x32xf32>, vector<32x128xf32>, vector<1x128xf32> -> vector<1x128xf32>
    %56 = arith.addf %54, %55 : vector<1x128xf32>
    %57 = vector.extract_strided_slice %56 {offsets = [0, 0], sizes = [1, 96], strides = [1, 1]} : vector<1x128xf32> to vector<1x96xf32>
    %58 = arith.negf %57 : vector<1x96xf32>
    %59 = math.exp %58 : vector<1x96xf32>
    %cst_23 = arith.constant 1.000000e+00 : f32
    %60 = vector.broadcast %cst_23 : f32 to vector<1x96xf32>
    %61 = arith.addf %60, %59 : vector<1x96xf32>
    %62 = arith.divf %60, %61 : vector<1x96xf32>
    %63 = vector.extract_strided_slice %62 {offsets = [0, 0], sizes = [1, 32], strides = [1, 1]} : vector<1x96xf32> to vector<1x32xf32>
    %64 = vector.extract_strided_slice %62 {offsets = [0, 32], sizes = [1, 32], strides = [1, 1]} : vector<1x96xf32> to vector<1x32xf32>
    %65 = vector.extract_strided_slice %62 {offsets = [0, 64], sizes = [1, 32], strides = [1, 1]} : vector<1x96xf32> to vector<1x32xf32>
    %66 = vector.extract_strided_slice %56 {offsets = [0, 96], sizes = [1, 32], strides = [1, 1]} : vector<1x128xf32> to vector<1x32xf32>
    %67 = math.tanh %66 : vector<1x32xf32>
    %68 = arith.mulf %64, %51 : vector<1x32xf32>
    %69 = arith.mulf %63, %67 : vector<1x32xf32>
    %70 = arith.addf %68, %69 : vector<1x32xf32>
    %71 = math.tanh %70 : vector<1x32xf32>
    %72 = arith.mulf %65, %71 : vector<1x32xf32>
    %73 = vector.extract_strided_slice %12 {offsets = [3, 0], sizes = [1, 128], strides = [1, 1]} : vector<8x128xf32> to vector<1x128xf32>
    %cst_24 = arith.constant dense<0.000000e+00> : vector<1x128xf32>
    %74 = tpu.matmul %72, %13, %cst_24 {dimension_numbers = #tpu.dot_dimension_numbers<[1], [0], [0], [1], [0, 0, 1, 1], [], []>} : vector<1x32xf32>, vector<32x128xf32>, vector<1x128xf32> -> vector<1x128xf32>
    %75 = arith.addf %73, %74 : vector<1x128xf32>
    %76 = vector.extract_strided_slice %75 {offsets = [0, 0], sizes = [1, 96], strides = [1, 1]} : vector<1x128xf32> to vector<1x96xf32>
    %77 = arith.negf %76 : vector<1x96xf32>
    %78 = math.exp %77 : vector<1x96xf32>
    %cst_25 = arith.constant 1.000000e+00 : f32
    %79 = vector.broadcast %cst_25 : f32 to vector<1x96xf32>
    %80 = arith.addf %79, %78 : vector<1x96xf32>
    %81 = arith.divf %79, %80 : vector<1x96xf32>
    %82 = vector.extract_strided_slice %81 {offsets = [0, 0], sizes = [1, 32], strides = [1, 1]} : vector<1x96xf32> to vector<1x32xf32>
    %83 = vector.extract_strided_slice %81 {offsets = [0, 32], sizes = [1, 32], strides = [1, 1]} : vector<1x96xf32> to vector<1x32xf32>
    %84 = vector.extract_strided_slice %81 {offsets = [0, 64], sizes = [1, 32], strides = [1, 1]} : vector<1x96xf32> to vector<1x32xf32>
    %85 = vector.extract_strided_slice %75 {offsets = [0, 96], sizes = [1, 32], strides = [1, 1]} : vector<1x128xf32> to vector<1x32xf32>
    %86 = math.tanh %85 : vector<1x32xf32>
    %87 = arith.mulf %83, %70 : vector<1x32xf32>
    %88 = arith.mulf %82, %86 : vector<1x32xf32>
    %89 = arith.addf %87, %88 : vector<1x32xf32>
    %90 = math.tanh %89 : vector<1x32xf32>
    %91 = arith.mulf %84, %90 : vector<1x32xf32>
    %92 = vector.extract_strided_slice %12 {offsets = [4, 0], sizes = [1, 128], strides = [1, 1]} : vector<8x128xf32> to vector<1x128xf32>
    %cst_26 = arith.constant dense<0.000000e+00> : vector<1x128xf32>
    %93 = tpu.matmul %91, %13, %cst_26 {dimension_numbers = #tpu.dot_dimension_numbers<[1], [0], [0], [1], [0, 0, 1, 1], [], []>} : vector<1x32xf32>, vector<32x128xf32>, vector<1x128xf32> -> vector<1x128xf32>
    %94 = arith.addf %92, %93 : vector<1x128xf32>
    %95 = vector.extract_strided_slice %94 {offsets = [0, 0], sizes = [1, 96], strides = [1, 1]} : vector<1x128xf32> to vector<1x96xf32>
    %96 = arith.negf %95 : vector<1x96xf32>
    %97 = math.exp %96 : vector<1x96xf32>
    %cst_27 = arith.constant 1.000000e+00 : f32
    %98 = vector.broadcast %cst_27 : f32 to vector<1x96xf32>
    %99 = arith.addf %98, %97 : vector<1x96xf32>
    %100 = arith.divf %98, %99 : vector<1x96xf32>
    %101 = vector.extract_strided_slice %100 {offsets = [0, 0], sizes = [1, 32], strides = [1, 1]} : vector<1x96xf32> to vector<1x32xf32>
    %102 = vector.extract_strided_slice %100 {offsets = [0, 32], sizes = [1, 32], strides = [1, 1]} : vector<1x96xf32> to vector<1x32xf32>
    %103 = vector.extract_strided_slice %100 {offsets = [0, 64], sizes = [1, 32], strides = [1, 1]} : vector<1x96xf32> to vector<1x32xf32>
    %104 = vector.extract_strided_slice %94 {offsets = [0, 96], sizes = [1, 32], strides = [1, 1]} : vector<1x128xf32> to vector<1x32xf32>
    %105 = math.tanh %104 : vector<1x32xf32>
    %106 = arith.mulf %102, %89 : vector<1x32xf32>
    %107 = arith.mulf %101, %105 : vector<1x32xf32>
    %108 = arith.addf %106, %107 : vector<1x32xf32>
    %109 = math.tanh %108 : vector<1x32xf32>
    %110 = arith.mulf %103, %109 : vector<1x32xf32>
    %111 = vector.extract_strided_slice %12 {offsets = [5, 0], sizes = [1, 128], strides = [1, 1]} : vector<8x128xf32> to vector<1x128xf32>
    %cst_28 = arith.constant dense<0.000000e+00> : vector<1x128xf32>
    %112 = tpu.matmul %110, %13, %cst_28 {dimension_numbers = #tpu.dot_dimension_numbers<[1], [0], [0], [1], [0, 0, 1, 1], [], []>} : vector<1x32xf32>, vector<32x128xf32>, vector<1x128xf32> -> vector<1x128xf32>
    %113 = arith.addf %111, %112 : vector<1x128xf32>
    %114 = vector.extract_strided_slice %113 {offsets = [0, 0], sizes = [1, 96], strides = [1, 1]} : vector<1x128xf32> to vector<1x96xf32>
    %115 = arith.negf %114 : vector<1x96xf32>
    %116 = math.exp %115 : vector<1x96xf32>
    %cst_29 = arith.constant 1.000000e+00 : f32
    %117 = vector.broadcast %cst_29 : f32 to vector<1x96xf32>
    %118 = arith.addf %117, %116 : vector<1x96xf32>
    %119 = arith.divf %117, %118 : vector<1x96xf32>
    %120 = vector.extract_strided_slice %119 {offsets = [0, 0], sizes = [1, 32], strides = [1, 1]} : vector<1x96xf32> to vector<1x32xf32>
    %121 = vector.extract_strided_slice %119 {offsets = [0, 32], sizes = [1, 32], strides = [1, 1]} : vector<1x96xf32> to vector<1x32xf32>
    %122 = vector.extract_strided_slice %119 {offsets = [0, 64], sizes = [1, 32], strides = [1, 1]} : vector<1x96xf32> to vector<1x32xf32>
    %123 = vector.extract_strided_slice %113 {offsets = [0, 96], sizes = [1, 32], strides = [1, 1]} : vector<1x128xf32> to vector<1x32xf32>
    %124 = math.tanh %123 : vector<1x32xf32>
    %125 = arith.mulf %121, %108 : vector<1x32xf32>
    %126 = arith.mulf %120, %124 : vector<1x32xf32>
    %127 = arith.addf %125, %126 : vector<1x32xf32>
    %128 = math.tanh %127 : vector<1x32xf32>
    %129 = arith.mulf %122, %128 : vector<1x32xf32>
    %130 = vector.extract_strided_slice %12 {offsets = [6, 0], sizes = [1, 128], strides = [1, 1]} : vector<8x128xf32> to vector<1x128xf32>
    %cst_30 = arith.constant dense<0.000000e+00> : vector<1x128xf32>
    %131 = tpu.matmul %129, %13, %cst_30 {dimension_numbers = #tpu.dot_dimension_numbers<[1], [0], [0], [1], [0, 0, 1, 1], [], []>} : vector<1x32xf32>, vector<32x128xf32>, vector<1x128xf32> -> vector<1x128xf32>
    %132 = arith.addf %130, %131 : vector<1x128xf32>
    %133 = vector.extract_strided_slice %132 {offsets = [0, 0], sizes = [1, 96], strides = [1, 1]} : vector<1x128xf32> to vector<1x96xf32>
    %134 = arith.negf %133 : vector<1x96xf32>
    %135 = math.exp %134 : vector<1x96xf32>
    %cst_31 = arith.constant 1.000000e+00 : f32
    %136 = vector.broadcast %cst_31 : f32 to vector<1x96xf32>
    %137 = arith.addf %136, %135 : vector<1x96xf32>
    %138 = arith.divf %136, %137 : vector<1x96xf32>
    %139 = vector.extract_strided_slice %138 {offsets = [0, 0], sizes = [1, 32], strides = [1, 1]} : vector<1x96xf32> to vector<1x32xf32>
    %140 = vector.extract_strided_slice %138 {offsets = [0, 32], sizes = [1, 32], strides = [1, 1]} : vector<1x96xf32> to vector<1x32xf32>
    %141 = vector.extract_strided_slice %138 {offsets = [0, 64], sizes = [1, 32], strides = [1, 1]} : vector<1x96xf32> to vector<1x32xf32>
    %142 = vector.extract_strided_slice %132 {offsets = [0, 96], sizes = [1, 32], strides = [1, 1]} : vector<1x128xf32> to vector<1x32xf32>
    %143 = math.tanh %142 : vector<1x32xf32>
    %144 = arith.mulf %140, %127 : vector<1x32xf32>
    %145 = arith.mulf %139, %143 : vector<1x32xf32>
    %146 = arith.addf %144, %145 : vector<1x32xf32>
    %147 = math.tanh %146 : vector<1x32xf32>
    %148 = arith.mulf %141, %147 : vector<1x32xf32>
    %149 = vector.extract_strided_slice %12 {offsets = [7, 0], sizes = [1, 128], strides = [1, 1]} : vector<8x128xf32> to vector<1x128xf32>
    %cst_32 = arith.constant dense<0.000000e+00> : vector<1x128xf32>
    %150 = tpu.matmul %148, %13, %cst_32 {dimension_numbers = #tpu.dot_dimension_numbers<[1], [0], [0], [1], [0, 0, 1, 1], [], []>} : vector<1x32xf32>, vector<32x128xf32>, vector<1x128xf32> -> vector<1x128xf32>
    %151 = arith.addf %149, %150 : vector<1x128xf32>
    %152 = vector.extract_strided_slice %151 {offsets = [0, 0], sizes = [1, 96], strides = [1, 1]} : vector<1x128xf32> to vector<1x96xf32>
    %153 = arith.negf %152 : vector<1x96xf32>
    %154 = math.exp %153 : vector<1x96xf32>
    %cst_33 = arith.constant 1.000000e+00 : f32
    %155 = vector.broadcast %cst_33 : f32 to vector<1x96xf32>
    %156 = arith.addf %155, %154 : vector<1x96xf32>
    %157 = arith.divf %155, %156 : vector<1x96xf32>
    %158 = vector.extract_strided_slice %157 {offsets = [0, 0], sizes = [1, 32], strides = [1, 1]} : vector<1x96xf32> to vector<1x32xf32>
    %159 = vector.extract_strided_slice %157 {offsets = [0, 32], sizes = [1, 32], strides = [1, 1]} : vector<1x96xf32> to vector<1x32xf32>
    %160 = vector.extract_strided_slice %157 {offsets = [0, 64], sizes = [1, 32], strides = [1, 1]} : vector<1x96xf32> to vector<1x32xf32>
    %161 = vector.extract_strided_slice %151 {offsets = [0, 96], sizes = [1, 32], strides = [1, 1]} : vector<1x128xf32> to vector<1x32xf32>
    %162 = math.tanh %161 : vector<1x32xf32>
    %163 = arith.mulf %159, %146 : vector<1x32xf32>
    %164 = arith.mulf %158, %162 : vector<1x32xf32>
    %165 = arith.addf %163, %164 : vector<1x32xf32>
    %166 = math.tanh %165 : vector<1x32xf32>
    %167 = arith.mulf %160, %166 : vector<1x32xf32>
    %c0_34 = arith.constant 0 : index
    %c0_35 = arith.constant 0 : index
    %168 = vector.load %arg7[%c0_34, %c0_35] : memref<32x32xf32, #tpu.memory_space<vmem>>, vector<32x32xf32>
    %cst_36 = arith.constant dense<0.000000e+00> : vector<1x32xf32>
    %169 = tpu.matmul %167, %168, %cst_36 {dimension_numbers = #tpu.dot_dimension_numbers<[1], [0], [0], [1], [0, 0, 1, 1], [], []>} : vector<1x32xf32>, vector<32x32xf32>, vector<1x32xf32> -> vector<1x32xf32>
    %c0_37 = arith.constant 0 : index
    %c0_38 = arith.constant 0 : index
    %170 = vector.load %arg8[%c0_37, %c0_38] : memref<1x32xf32, #tpu.memory_space<vmem>>, vector<1x32xf32>
    %171 = arith.addf %169, %170 : vector<1x32xf32>
    %172 = vector.broadcast %171 : vector<1x32xf32> to vector<2x32xf32>
    %173 = arith.mulf %172, %6 : vector<2x32xf32>
    %174 = arith.mulf %173, %173 : vector<2x32xf32>
    %cst_39 = arith.constant dense<0.000000e+00> : vector<2xf32>
    %175 = vector.multi_reduction <add>, %174, %cst_39 [1] : vector<2x32xf32> to vector<2xf32>
    %176 = vector.shape_cast %175 : vector<2xf32> to vector<2x1xf32>
    %cst_40 = arith.constant 1.000000e-24 : f32
    %177 = vector.broadcast %cst_40 : f32 to vector<2x1xf32>
    %178 = arith.maximumf %176, %177 : vector<2x1xf32>
    %179 = math.rsqrt %178 : vector<2x1xf32>
    %180 = vector.broadcast %179 : vector<2x1xf32> to vector<2x32xf32>
    %181 = arith.mulf %173, %180 : vector<2x32xf32>
    %c0_41 = arith.constant 0 : index
    %c0_42 = arith.constant 0 : index
    %182 = vector.load %arg9[%c0_41, %c0_42] : memref<32x128xf32, #tpu.memory_space<vmem>>, vector<32x128xf32>
    %cst_43 = arith.constant dense<0.000000e+00> : vector<2x128xf32>
    %183 = tpu.matmul %181, %182, %cst_43 {dimension_numbers = #tpu.dot_dimension_numbers<[1], [0], [0], [1], [0, 0, 1, 1], [], []>} : vector<2x32xf32>, vector<32x128xf32>, vector<2x128xf32> -> vector<2x128xf32>
    %c0_44 = arith.constant 0 : index
    %c0_45 = arith.constant 0 : index
    %184 = vector.load %arg10[%c0_44, %c0_45] : memref<1x128xf32, #tpu.memory_space<vmem>>, vector<1x128xf32>
    %185 = vector.broadcast %184 : vector<1x128xf32> to vector<2x128xf32>
    %186 = arith.addf %183, %185 : vector<2x128xf32>
    %c0_46 = arith.constant 0 : index
    %c0_47 = arith.constant 0 : index
    %187 = vector.load %arg11[%c0_46, %c0_47] : memref<2x128xf32, #tpu.memory_space<vmem>>, vector<2x128xf32>
    tpu.vector_store %arg11[%c0_46, %c0_47], %186 {strides = array<i32>} : memref<2x128xf32, #tpu.memory_space<vmem>>, vector<2x128xf32>,
    return
  }
}

</mosaic_0001>

<bundles_post_ra>
// kernel: vga_forward.1
= control target key start
LH: loop header
LB: loop body
LE: loop exit
PB: predicated region body
PF: predicated region fallthrough
CT: control target
= control target key end

     0   :  { %vm41_vm0 = vcmask 523264   ;;  %s1898_s0 = inlined_call_operand.vmem [shape: f32[2,8,64], index: 0, kind: input, shape index: {}]   ;;  %s1899_s1 = inlined_call_operand.vmem [shape: f32[8,16], index: 1, kind: input, shape index: {}]   ;;  %s1900_s2 = inlined_call_operand.vmem [shape: f32[8,32], index: 2, kind: input, shape index: {}]   ;;  %s1901_s3 = inlined_call_operand.vmem [shape: f32[1,32], index: 3, kind: input, shape index: {}]   ;;  %s1902_s4 = inlined_call_operand.vmem [shape: f32[16,128], index: 4, kind: input, shape index: {}]   ;;  %s1903_s5 = inlined_call_operand.vmem [shape: f32[32,128], index: 5, kind: input, shape index: {}]   ;;  %s1904_s6 = inlined_call_operand.vmem [shape: f32[1,128], index: 6, kind: input, shape index: {}]   ;;  %s1905_s7 = inlined_call_operand.vmem [shape: f32[32,32], index: 7, kind: input, shape index: {}]   ;;  %s1906_s8 = inlined_call_operand.vmem [shape: f32[1,32], index: 8, kind: input, shape index: {}]   ;;  %s1907_s9 = inlined_call_operand.vmem [shape: f32[32,128], index: 9, kind: input, shape index: {}]   ;;  %s1908_s10 = inlined_call_operand.vmem [shape: f32[1,128], index: 10, kind: input, shape index: {}]   ;;  %s1909_s11 = inlined_call_operand.hbm [shape: f32[2,128], index: 11, kind: output, shape index: {}]  }
   0x1   :  { %v39_v0 = vld [vmem:[%s1898_s0] sm:$0xff]  ;;  %v40_v1 = vld [vmem:[%s1898_s0 + $0x8] sm:$0xff] }
   0x2   :  { %16 = vsyncpa [#allocation3], 0  ;;  %v42_v2 = vsel %vm41_vm0, %v39_v0, 0.0  ;;  %v45_v3 = vsel %vm41_vm0, %v40_v1, 0.0  ;;  %v1629_v4 = vmov 0.0   ;;  %v48_v5 = vld [vmem:[%s1900_s2] sm:$0xff]  ;;  %v58_v17 = vlaneseq }
   0x3   :  { %43 = vadd.xlane.f32.xlu0 %v42_v2  ;;  %1348 = vmatprep.subr.mxu0 %v1629_v4  ;;  %vm1630_vm1 = vmmov 0   ;;  %v1631_v6 = vmov 0.0|0.0   ;;  %v144_v7 = vld [vmem:[%s1902_s4] sm:$0xff]  ;;  %v145_v8 = vld [vmem:[%s1902_s4 + $0x8] sm:$0xff]  ;;  %vm153_vm2 = vcmask 130048   ;;  %v229_v14 = vld [vmem:[%s1903_s5 + $0x10] sm:$0xff] }
   0x4   :  { %1349 = vmatpush3.msra.mxu0 %v48_v5  ;;  %1350 = vmatprep.mubr.msk.f32.mxu0 %vm1630_vm1, %v1629_v4  ;;  %v1471_v9 = vpack.c.bf16 %v145_v8, %v144_v7  ;;  %v227_v10 = vld [vmem:[%s1903_s5] sm:$0xff]  ;;  %v228_v11 = vld [vmem:[%s1903_s5 + $0x8] sm:$0xff]  ;;  %v230_v15 = vld [vmem:[%s1903_s5 + $0x18] sm:$0xff]  ;;  %v59_v18 = vand.u32 127, %v58_v17  ;;  %v1743_v19 = vshrl.u32 %v58_v17, 7  ;;  %vm68_vm3 = vcmask 1041409  }
   0x5   :  { %1473 = vmatprep.subr.bf16.mxu0 %v1631_v6  ;;  %1470 = vmatprep.subr.bf16.mxu1 %v1631_v6  ;;  %v143_v12 = vld [vmem:[%s1899_s1] sm:$0xff]  ;;  %v1727_v13 = vpack.c.bf16 %v228_v11, %v227_v10  ;;  %v1739_v16 = vpack.c.bf16 %v230_v15, %v229_v14  ;;  %vm70_vm4 = vcmask 64512   ;;  %s1632_s15 = smov 32   ;;  %vm231_vm5 = vcmask 261120   ;;  %s1634_s13 = smov [#allocation2]  }
   0x6   :  { %1357 = vmatprep.mubr.msk.f32.mxu1 %vm1630_vm1, %v1629_v4  ;;  %1472 = vmatpush3.bf16.msra.mxu1 %v1471_v9  ;;  %v62_v21 = vsub.s32 %v59_v18, %v1743_v19  ;;  %v1273_v30 = vld [vmem:[%s1904_s6] ss:$0 sm:$0xff]  ;;  %s1633_s6 = smov 64   ;;  %vm1165_vm6 = vcmask 254976   ;;  %s1263_s14 = sshll.u32 %s1634_s13, 4  ;;  %s1264_s14 = int_to_ptr.vmem [resolvable:$true] %s1263_s14 }
   0x7   :  { %46 = vadd.xlane.f32.xlu0 %v45_v3  ;;  %1479 = vmatprep.subr.bf16.mxu1 %v1631_v6  ;;  %p1610_p1 = scmp.lt.s32.totalorder %s1264_s14, %s1264_s14 }
   0x9   :  { %1358 = vmatmul.mubr.msk.f32.vlgmr.msra.gmra.mrb[0].mxu1 %vm153_vm2, %v143_v12 }
   0xa   :  { %1481 = vmatpush3.bf16.msra.mxu1 %v1727_v13  ;;  %1379 = vmatprep.mubr.msk.f32.mxu1 %vm1630_vm1, %v1629_v4 }
   0xb   :  { %1482 = vmatprep.subr.bf16.mxu1 %v1631_v6 }
   0xe   :  { %1484 = vmatpush3.bf16.msra.mxu1 %v1739_v16 }
   0xf   :  { %1491 = vmatprep.subr.bf16.mxu1 %v1631_v6 }
  0x90   :  { %v44_v20 = vpop.xlane.xlu0 %43 }
  0x91   :  { %v63_v23 = vrot.slane %v44_v20, %v62_v21 }
  0x94   :  { %v47_v22 = vpop.xlane.xlu0 %46 }
  0x95   :  { %v67_v24 = vrot.slane %v47_v22, %v62_v21 }
  0x97   :  { %v69_v25 = vsel %vm68_vm3, %v67_v24, %v63_v23 }
  0x98   :  { %1351 = vmatmul.mubr.msk.f32.vlgmr.msra.gmra.mrb[0].mxu0 %vm70_vm4, %v69_v25 }
  0x99   :  { %1475 = vmatpush3.bf16.msra.mxu0 %v1727_v13  ;;  %1368 = vmatprep.mubr.msk.f32.mxu0 %vm1630_vm1, %v1629_v4 }
  0x9a   :  { %1476 = vmatprep.subr.bf16.mxu0 %v1631_v6 }
  0x9d   :  { %1478 = vmatpush3.bf16.msra.mxu0 %v1739_v16 }
  0x9e   :  { %1485 = vmatprep.subr.bf16.mxu0 %v1631_v6 }
  0xa0   :  { %1369 = vmatmul.mubr.f32.vlgmr.msra.gmra.mrb[2].mxu0 %v1629_v4 }
  0xa1   :  { %1487 = vmatpush3.bf16.msra.mxu0 %v1727_v13  ;;  %1390 = vmatprep.mubr.msk.f32.mxu0 %vm1630_vm1, %v1629_v4 }
  0xa2   :  { %1488 = vmatprep.subr.bf16.mxu0 %v1631_v6 }
  0xa5   :  { %1490 = vmatpush3.bf16.msra.mxu0 %v1739_v16 }
  0xa6   :  { %1497 = vmatprep.subr.bf16.mxu0 %v1631_v6 }
  0xdc   :  { %v223_v26 = vpop.f32.mrb[0].mxu1 }
  0xdd   :  { %v1359_v27 = vpop.f32.mrb[1].mxu1  ;;  %v1764_v31 = vadd.f32 %v1273_v30, %v223_v26 }
 0x16b   :  { %v1759_v28 = vpop.f32.mrb[0].mxu0 }
 0x16c   :  { %v1352_v29 = vpop.f32.mrb[1].mxu0 }
 0x173   :  { %v301_v32 = vpop.f32.mrb[2].mxu0 }
 0x174   :  { %v305_v33 = vadd.f32 %v301_v32, %v1764_v31  ;;  %v1370_v34 = vpop.f32.mrb[3].mxu0 }
 0x176   :  { %1539 = vtanh.f32 %v305_v33  ;;  %v1275_v36 = vmul.f32 -1.442695, %v305_v33 }
 0x178   :  { %1541 = vpow2.f32 %v1275_v36 }
 0x180   :  { %v1540_v35 = vpop.eup %1539 }
 0x181   :  { %315 = vrot.lane.b32.xlu1 %v1540_v35, %s1632_s15 }
 0x182   :  { %v1542_v37 = vpop.eup %1541 }
 0x183   :  { %v309_v38 = vadd.f32 1.0, %v1542_v37 }
 0x185   :  { %1543 = vrcp.f32 %v309_v38 }
 0x18f   :  { %v1544_v39 = vpop.eup %1543 }
 0x190   :  { %v313_v42 = vmul.f32 0.0, %v1544_v39 }
 0x1f3   :  { %v316_v40 = vpop.permute.xlu1 %315 }
 0x1f4   :  { %v318_v41 = vmul.f32 %v1544_v39, %v316_v40 }
 0x1f6   :  { %320 = vrot.lane.b32.xlu1 %v318_v41, %s1632_s15 }
 0x268   :  { %v321_v43 = vpop.permute.xlu1 %320 }
 0x269   :  { %v323_v44 = vadd.f32 %v321_v43, %v313_v42 }
 0x26b   :  { %1545 = vtanh.f32 %v323_v44  ;;  %v417_v60 = vrot.slane %v323_v44, 7 }
 0x275   :  { %v1546_v45 = vpop.eup %1545 }
 0x276   :  { %326 = vrot.lane.b32.xlu0 %v1546_v45, %s1632_s15 }
 0x2e8   :  { %v327_v46 = vpop.permute.xlu0 %326 }
 0x2e9   :  { %v329_v47 = vmul.f32 %v1544_v39, %v327_v46 }
 0x2eb   :  { %331 = vrot.lane.b32.xlu1 %v329_v47, %s1633_s6 }
 0x35d   :  { %v332_v48 = vpop.permute.xlu1 %331 }
 0x35e   :  { %1380 = vmatmul.mubr.msk.f32.vlgmr.msra.gmra.mrb[2].mxu1 %vm231_vm5, %v332_v48 }
 0x35f   :  { %1493 = vmatpush3.bf16.msra.mxu1 %v1727_v13  ;;  %1401 = vmatprep.mubr.msk.f32.mxu1 %vm1630_vm1, %v1629_v4 }
 0x360   :  { %1494 = vmatprep.subr.bf16.mxu1 %v1631_v6 }
 0x363   :  { %1496 = vmatpush3.bf16.msra.mxu1 %v1739_v16 }
 0x364   :  { %1503 = vmatprep.subr.bf16.mxu1 %v1631_v6 }
 0x431   :  { %v401_v49 = vpop.f32.mrb[2].mxu1 }
 0x432   :  { %v406_v50 = vrot.slane %v401_v49, 7  ;;  %v1381_v51 = vpop.f32.mrb[3].mxu1 }
 0x434   :  { %v408_v52 = vadd.f32 %v406_v50, %v1764_v31 }
 0x436   :  { %1547 = vtanh.f32 %v408_v52  ;;  %v1277_v54 = vmul.f32 -1.442695, %v408_v52 }
 0x438   :  { %1549 = vpow2.f32 %v1277_v54 }
 0x440   :  { %v1548_v53 = vpop.eup %1547 }
 0x441   :  { %421 = vrot.lane.b32.xlu1 %v1548_v53, %s1632_s15 }
 0x442   :  { %v1550_v55 = vpop.eup %1549 }
 0x443   :  { %v412_v56 = vadd.f32 1.0, %v1550_v55 }
 0x445   :  { %1551 = vrcp.f32 %v412_v56 }
 0x44f   :  { %v1552_v57 = vpop.eup %1551 }
 0x450   :  { %v419_v61 = vmul.f32 %v1552_v57, %v417_v60 }
 0x4b3   :  { %v422_v58 = vpop.permute.xlu1 %421 }
 0x4b4   :  { %v424_v59 = vmul.f32 %v1552_v57, %v422_v58 }
 0x4b6   :  { %426 = vrot.lane.b32.xlu1 %v424_v59, %s1632_s15 }
 0x528   :  { %v427_v62 = vpop.permute.xlu1 %426 }
 0x529   :  { %v429_v63 = vadd.f32 %v427_v62, %v419_v61 }
 0x52b   :  { %1553 = vtanh.f32 %v429_v63  ;;  %v524_v21 = vrot.slane %v429_v63, 7 }
 0x535   :  { %v1554_v0 = vpop.eup %1553 }
 0x536   :  { %432 = vrot.lane.b32.xlu1 %v1554_v0, %s1632_s15 }
 0x5a8   :  { %v433_v1 = vpop.permute.xlu1 %432 }
 0x5a9   :  { %v435_v2 = vmul.f32 %v1552_v57, %v433_v1 }
 0x5ab   :  { %v437_v3 = vrot.slane %v435_v2, 1 }
 0x5ad   :  { %438 = vrot.lane.b32.xlu1 %v437_v3, %s1633_s6 }
 0x61f   :  { %v439_v5 = vpop.permute.xlu1 %438 }
 0x620   :  { %1391 = vmatmul.mubr.msk.f32.vlgmr.msra.gmra.mrb[4].mxu0 %vm231_vm5, %v439_v5 }
 0x621   :  { %1499 = vmatpush3.bf16.msra.mxu0 %v1727_v13  ;;  %1412 = vmatprep.mubr.msk.f32.mxu0 %vm1630_vm1, %v1629_v4 }
 0x622   :  { %1500 = vmatprep.subr.bf16.mxu0 %v1631_v6 }
 0x625   :  { %1502 = vmatpush3.bf16.msra.mxu0 %v1739_v16 }
 0x626   :  { %1509 = vmatprep.subr.bf16.mxu0 %v1631_v6 }
 0x6f3   :  { %v508_v7 = vpop.f32.mrb[4].mxu0 }
 0x6f4   :  { %v513_v8 = vrot.slane %v508_v7, 6  ;;  %v1392_v9 = vpop.f32.mrb[5].mxu0 }
 0x6f6   :  { %v515_v10 = vadd.f32 %v513_v8, %v1764_v31 }
 0x6f8   :  { %1555 = vtanh.f32 %v515_v10  ;;  %v1279_v12 = vmul.f32 -1.442695, %v515_v10 }
 0x6fa   :  { %1557 = vpow2.f32 %v1279_v12 }
 0x702   :  { %v1556_v11 = vpop.eup %1555 }
 0x703   :  { %528 = vrot.lane.b32.xlu1 %v1556_v11, %s1632_s15 }
 0x704   :  { %v1558_v14 = vpop.eup %1557 }
 0x705   :  { %v519_v15 = vadd.f32 1.0, %v1558_v14 }
 0x707   :  { %1559 = vrcp.f32 %v519_v15 }
 0x711   :  { %v1560_v17 = vpop.eup %1559 }
 0x712   :  { %v526_v22 = vmul.f32 %v1560_v17, %v524_v21 }
 0x775   :  { %v529_v18 = vpop.permute.xlu1 %528 }
 0x776   :  { %v531_v20 = vmul.f32 %v1560_v17, %v529_v18 }
 0x778   :  { %533 = vrot.lane.b32.xlu0 %v531_v20, %s1632_s15 }
 0x7ea   :  { %v534_v23 = vpop.permute.xlu0 %533 }
 0x7eb   :  { %v536_v24 = vadd.f32 %v534_v23, %v526_v22 }
 0x7ed   :  { %1561 = vtanh.f32 %v536_v24  ;;  %v631_v43 = vrot.slane %v536_v24, 7 }
 0x7f7   :  { %v1562_v25 = vpop.eup %1561 }
 0x7f8   :  { %539 = vrot.lane.b32.xlu1 %v1562_v25, %s1632_s15 }
 0x86a   :  { %v540_v26 = vpop.permute.xlu1 %539 }
 0x86b   :  { %v542_v27 = vmul.f32 %v1560_v17, %v540_v26 }
 0x86d   :  { %v544_v29 = vrot.slane %v542_v27, 2 }
 0x86f   :  { %545 = vrot.lane.b32.xlu0 %v544_v29, %s1633_s6 }
 0x8e1   :  { %v546_v30 = vpop.permute.xlu0 %545 }
 0x8e2   :  { %1402 = vmatmul.mubr.msk.f32.vlgmr.msra.gmra.mrb[4].mxu1 %vm231_vm5, %v546_v30 }
 0x8e3   :  { %1505 = vmatpush3.bf16.msra.mxu1 %v1727_v13  ;;  %1423 = vmatprep.mubr.msk.f32.mxu1 %vm1630_vm1, %v1629_v4 }
 0x8e4   :  { %1506 = vmatprep.subr.bf16.mxu1 %v1631_v6 }
 0x8e7   :  { %1508 = vmatpush3.bf16.msra.mxu1 %v1739_v16 }
 0x8e8   :  { %1515 = vmatprep.subr.bf16.mxu1 %v1631_v6 }
 0x9b5   :  { %v615_v32 = vpop.f32.mrb[4].mxu1 }
 0x9b6   :  { %v620_v33 = vrot.slane %v615_v32, 5  ;;  %v1403_v34 = vpop.f32.mrb[5].mxu1 }
 0x9b8   :  { %v622_v35 = vadd.f32 %v620_v33, %v1764_v31 }
 0x9ba   :  { %1563 = vtanh.f32 %v622_v35  ;;  %v1281_v37 = vmul.f32 -1.442695, %v622_v35 }
 0x9bc   :  { %1565 = vpow2.f32 %v1281_v37 }
 0x9c4   :  { %v1564_v36 = vpop.eup %1563 }
 0x9c5   :  { %635 = vrot.lane.b32.xlu1 %v1564_v36, %s1632_s15 }
 0x9c6   :  { %v1566_v38 = vpop.eup %1565 }
 0x9c7   :  { %v626_v39 = vadd.f32 1.0, %v1566_v38 }
 0x9c9   :  { %1567 = vrcp.f32 %v626_v39 }
 0x9d3   :  { %v1568_v40 = vpop.eup %1567 }
 0x9d4   :  { %v633_v44 = vmul.f32 %v1568_v40, %v631_v43 }
 0xa37   :  { %v636_v41 = vpop.permute.xlu1 %635 }
 0xa38   :  { %v638_v42 = vmul.f32 %v1568_v40, %v636_v41 }
 0xa3a   :  { %640 = vrot.lane.b32.xlu0 %v638_v42, %s1632_s15 }
 0xaac   :  { %v641_v45 = vpop.permute.xlu0 %640 }
 0xaad   :  { %v643_v46 = vadd.f32 %v641_v45, %v633_v44 }
 0xaaf   :  { %1569 = vtanh.f32 %v643_v46  ;;  %v738_v63 = vrot.slane %v643_v46, 7 }
 0xab9   :  { %v1570_v47 = vpop.eup %1569 }
 0xaba   :  { %646 = vrot.lane.b32.xlu1 %v1570_v47, %s1632_s15 }
 0xb2c   :  { %v647_v48 = vpop.permute.xlu1 %646 }
 0xb2d   :  { %v649_v49 = vmul.f32 %v1568_v40, %v647_v48 }
 0xb2f   :  { %v651_v50 = vrot.slane %v649_v49, 3 }
 0xb31   :  { %652 = vrot.lane.b32.xlu0 %v651_v50, %s1633_s6 }
 0xba3   :  { %v653_v51 = vpop.permute.xlu0 %652 }
 0xba4   :  { %1413 = vmatmul.mubr.msk.f32.vlgmr.msra.gmra.mrb[6].mxu0 %vm231_vm5, %v653_v51 }
 0xba5   :  { %1511 = vmatpush3.bf16.msra.mxu0 %v1727_v13  ;;  %1434 = vmatprep.mubr.msk.f32.mxu0 %vm1630_vm1, %v1629_v4 }
 0xba6   :  { %1512 = vmatprep.subr.bf16.mxu0 %v1631_v6 }
 0xba9   :  { %1514 = vmatpush3.bf16.msra.mxu0 %v1739_v16 }
 0xbaa   :  { %1521 = vmatprep.subr.bf16.mxu0 %v1631_v6 }
 0xc77   :  { %v722_v52 = vpop.f32.mrb[6].mxu0 }
 0xc78   :  { %v727_v53 = vrot.slane %v722_v52, 4  ;;  %v1414_v54 = vpop.f32.mrb[7].mxu0 }
 0xc7a   :  { %v729_v55 = vadd.f32 %v727_v53, %v1764_v31 }
 0xc7c   :  { %1571 = vtanh.f32 %v729_v55  ;;  %v1283_v57 = vmul.f32 -1.442695, %v729_v55 }
 0xc7e   :  { %1573 = vpow2.f32 %v1283_v57 }
 0xc86   :  { %v1572_v56 = vpop.eup %1571 }
 0xc87   :  { %742 = vrot.lane.b32.xlu1 %v1572_v56, %s1632_s15 }
 0xc88   :  { %v1574_v58 = vpop.eup %1573 }
 0xc89   :  { %v733_v59 = vadd.f32 1.0, %v1574_v58 }
 0xc8b   :  { %1575 = vrcp.f32 %v733_v59 }
 0xc95   :  { %v1576_v60 = vpop.eup %1575 }
 0xc96   :  { %v740_v0 = vmul.f32 %v1576_v60, %v738_v63 }
 0xcf9   :  { %v743_v61 = vpop.permute.xlu1 %742 }
 0xcfa   :  { %v745_v62 = vmul.f32 %v1576_v60, %v743_v61 }
 0xcfc   :  { %747 = vrot.lane.b32.xlu0 %v745_v62, %s1632_s15 }
 0xd6e   :  { %v748_v1 = vpop.permute.xlu0 %747 }
 0xd6f   :  { %v750_v2 = vadd.f32 %v748_v1, %v740_v0 }
 0xd71   :  { %1577 = vtanh.f32 %v750_v2 }
 0xd7b   :  { %v1578_v3 = vpop.eup %1577 }
 0xd7c   :  { %753 = vrot.lane.b32.xlu1 %v1578_v3, %s1632_s15  ;;  %v1079_v3 = vld [vmem:[%s1905_s7 + $0x8] sm:$0xff] }
 0xdee   :  { %v754_v5 = vpop.permute.xlu1 %753 }
 0xdef   :  { %v756_v7 = vmul.f32 %v1576_v60, %v754_v5  ;;  %v1080_v5 = vld [vmem:[%s1905_s7 + $0x10] sm:$0xff] }
 0xdf1   :  { %v758_v8 = vrot.slane %v756_v7, 4 }
 0xdf3   :  { %759 = vrot.lane.b32.xlu0 %v758_v8, %s1633_s6  ;;  %v1081_v8 = vld [vmem:[%s1905_s7 + $0x18] sm:$0xff] }
 0xe65   :  { %v760_v9 = vpop.permute.xlu0 %759 }
 0xe66   :  { %1424 = vmatmul.mubr.msk.f32.vlgmr.msra.gmra.mrb[6].mxu1 %vm231_vm5, %v760_v9  ;;  %v1525_v9 = vpack.c.bf16 %v1081_v8, %v1080_v5 }
 0xe67   :  { %1517 = vmatpush3.bf16.msra.mxu1 %v1727_v13  ;;  %1445 = vmatprep.mubr.msk.f32.mxu1 %vm1630_vm1, %v1629_v4 }
 0xe68   :  { %1518 = vmatprep.subr.bf16.mxu1 %v1631_v6 }
 0xe6b   :  { %1520 = vmatpush3.bf16.msra.mxu1 %v1739_v16  ;;  %v845_v16 = vrot.slane %v750_v2, 7 }
 0xe6c   :  { %1527 = vmatprep.subr.bf16.mxu1 %v1631_v6 }
 0xf39   :  { %v829_v10 = vpop.f32.mrb[6].mxu1 }
 0xf3a   :  { %v834_v11 = vrot.slane %v829_v10, 3  ;;  %v1425_v12 = vpop.f32.mrb[7].mxu1 }
 0xf3c   :  { %v836_v14 = vadd.f32 %v834_v11, %v1764_v31 }
 0xf3e   :  { %1579 = vtanh.f32 %v836_v14  ;;  %v1285_v17 = vmul.f32 -1.442695, %v836_v14 }
 0xf40   :  { %1581 = vpow2.f32 %v1285_v17  ;;  %v1082_v17 = vld [vmem:[%s1906_s8] sm:$0x1] }
 0xf48   :  { %v1580_v15 = vpop.eup %1579 }
 0xf49   :  { %849 = vrot.lane.b32.xlu1 %v1580_v15, %s1632_s15 }
 0xf4a   :  { %v1582_v13 = vpop.eup %1581 }
 0xf4b   :  { %v840_v18 = vadd.f32 1.0, %v1582_v13  ;;  %v1161_v13 = vsub.s32 0, %v1743_v19  ;;  %v1173_v19 = vld [vmem:[%s1907_s9 + $0x8] sm:$0xff] }
 0xf4d   :  { %1583 = vrcp.f32 %v840_v18  ;;  %v1271_v18 = vld [vmem:[%s1901_s3] ss:$0 sm:$0xff] }
 0xf57   :  { %v1584_v20 = vpop.eup %1583 }
 0xf58   :  { %v847_v23 = vmul.f32 %v1584_v20, %v845_v16  ;;  %v140_v16 = vadd.f32 %v1271_v18, %v1759_v28  ;;  %v1174_v28 = vld [vmem:[%s1907_s9 + $0x10] sm:$0xff] }
 0xfbb   :  { %v850_v21 = vpop.permute.xlu1 %849 }
 0xfbc   :  { %v852_v22 = vmul.f32 %v1584_v20, %v850_v21 }
 0xfbe   :  { %854 = vrot.lane.b32.xlu0 %v852_v22, %s1632_s15 }
0x1030   :  { %v855_v24 = vpop.permute.xlu0 %854 }
0x1031   :  { %v857_v25 = vadd.f32 %v855_v24, %v847_v23 }
0x1033   :  { %1585 = vtanh.f32 %v857_v25  ;;  %v952_v44 = vrot.slane %v857_v25, 7 }
0x103d   :  { %v1586_v26 = vpop.eup %1585 }
0x103e   :  { %860 = vrot.lane.b32.xlu1 %v1586_v26, %s1632_s15 }
0x10b0   :  { %v861_v27 = vpop.permute.xlu1 %860 }
0x10b1   :  { %v863_v29 = vmul.f32 %v1584_v20, %v861_v27  ;;  %v1172_v27 = vld [vmem:[%s1907_s9] sm:$0xff] }
0x10b3   :  { %v865_v30 = vrot.slane %v863_v29, 5  ;;  %v1528_v29 = vpack.c.bf16 %v1173_v19, %v1172_v27 }
0x10b5   :  { %866 = vrot.lane.b32.xlu0 %v865_v30, %s1633_s6  ;;  %v1175_v30 = vld [vmem:[%s1907_s9 + $0x18] sm:$0xff]  ;;  %s1605_s9 = scalar_lea.vmem %s1264_s14, 32 }
0x10b6   :  { %p1606_p0 = scmp.ne.s32.totalorder %s1264_s14, %s1605_s9  ;;  %p1611_p2 = scmp.lt.s32.totalorder %s1605_s9, %s1605_s9 }
0x10b8   :  { %p1612_p3 = por %p1611_p2, %p1610_p1 }
0x10ba   :  { %p1613_p4 = pnand %p1612_p3, %p1606_p0 }
0x1127   :  { %v867_v32 = vpop.permute.xlu0 %866 }
0x1128   :  { %1435 = vmatmul.mubr.msk.f32.vlgmr.msra.gmra.mrb[8].mxu0 %vm231_vm5, %v867_v32  ;;  %v1531_v32 = vpack.c.bf16 %v1175_v30, %v1174_v28 }
0x1129   :  { %1456 = vmatprep.mubr.msk.f32.mxu0 %vm1630_vm1, %v1629_v4 }
0x11fb   :  { %v936_v33 = vpop.f32.mrb[8].mxu0 }
0x11fc   :  { %v941_v34 = vrot.slane %v936_v33, 2  ;;  %v1436_v35 = vpop.f32.mrb[9].mxu0 }
0x11fe   :  { %v943_v36 = vadd.f32 %v941_v34, %v1764_v31 }
0x1200   :  { %1587 = vtanh.f32 %v943_v36  ;;  %v1287_v38 = vmul.f32 -1.442695, %v943_v36 }
0x1202   :  { %1589 = vpow2.f32 %v1287_v38 }
0x120a   :  { %v1588_v37 = vpop.eup %1587 }
0x120b   :  { %956 = vrot.lane.b32.xlu1 %v1588_v37, %s1632_s15 }
0x120c   :  { %v1590_v39 = vpop.eup %1589 }
0x120d   :  { %v947_v40 = vadd.f32 1.0, %v1590_v39 }
0x120f   :  { %1591 = vrcp.f32 %v947_v40 }
0x1219   :  { %v1592_v41 = vpop.eup %1591 }
0x121a   :  { %v954_v45 = vmul.f32 %v1592_v41, %v952_v44 }
0x127d   :  { %v957_v42 = vpop.permute.xlu1 %956 }
0x127e   :  { %v959_v43 = vmul.f32 %v1592_v41, %v957_v42 }
0x1280   :  { %961 = vrot.lane.b32.xlu0 %v959_v43, %s1632_s15 }
0x12f2   :  { %v962_v46 = vpop.permute.xlu0 %961 }
0x12f3   :  { %v964_v47 = vadd.f32 %v962_v46, %v954_v45 }
0x12f5   :  { %1593 = vtanh.f32 %v964_v47 }
0x12ff   :  { %v1594_v48 = vpop.eup %1593 }
0x1300   :  { %967 = vrot.lane.b32.xlu1 %v1594_v48, %s1632_s15 }
0x1372   :  { %v968_v49 = vpop.permute.xlu1 %967 }
0x1373   :  { %v970_v50 = vmul.f32 %v1592_v41, %v968_v49 }
0x1375   :  { %v972_v51 = vrot.slane %v970_v50, 6 }
0x1377   :  { %973 = vrot.lane.b32.xlu0 %v972_v51, %s1633_s6 }
0x13e9   :  { %v974_v52 = vpop.permute.xlu0 %973 }
0x13ea   :  { %1446 = vmatmul.mubr.msk.f32.vlgmr.msra.gmra.mrb[8].mxu1 %vm231_vm5, %v974_v52 }
0x13eb   :  { %1467 = vmatprep.mubr.msk.f32.mxu1 %vm1630_vm1, %v1629_v4  ;;  %v1059_v4 = vrot.slane %v964_v47, 7  ;;  %1529 = vmatpush3.bf16.msra.mxu1 %v1528_v29 }
0x13ec   :  { %1530 = vmatprep.subr.bf16.mxu1 %v1631_v6 }
0x13ef   :  { %1532 = vmatpush3.bf16.msra.mxu1 %v1531_v32 }
0x14bd   :  { %v1043_v53 = vpop.f32.mrb[8].mxu1 }
0x14be   :  { %v1048_v54 = vrot.slane %v1043_v53, 1  ;;  %v1447_v55 = vpop.f32.mrb[9].mxu1 }
0x14c0   :  { %v1050_v56 = vadd.f32 %v1048_v54, %v1764_v31  ;;  %v1078_v31 = vld [vmem:[%s1905_s7] sm:$0xff] }
0x14c1   :  { %v1522_v7 = vpack.c.bf16 %v1079_v3, %v1078_v31 }
0x14c2   :  { %1595 = vtanh.f32 %v1050_v56  ;;  %v1289_v58 = vmul.f32 -1.442695, %v1050_v56 }
0x14c3   :  { %1523 = vmatpush3.bf16.msra.mxu0 %v1522_v7 }
0x14c4   :  { %1597 = vpow2.f32 %v1289_v58  ;;  %1524 = vmatprep.subr.bf16.mxu0 %v1631_v6  ;;  %v1291_v6 = vld [vmem:[%s1908_s10] ss:$0 sm:$0xff] }
0x14c7   :  { %1526 = vmatpush3.bf16.msra.mxu0 %v1525_v9 }
0x14cc   :  { %v1596_v57 = vpop.eup %1595 }
0x14cd   :  { %1063 = vrot.lane.b32.xlu1 %v1596_v57, %s1632_s15 }
0x14ce   :  { %v1598_v59 = vpop.eup %1597 }
0x14cf   :  { %v1054_v60 = vadd.f32 1.0, %v1598_v59 }
0x14d1   :  { %1599 = vrcp.f32 %v1054_v60 }
0x14db   :  { %v1600_v61 = vpop.eup %1599 }
0x14dc   :  { %v1061_v0 = vmul.f32 %v1600_v61, %v1059_v4 }
0x153f   :  { %v1064_v62 = vpop.permute.xlu1 %1063 }
0x1540   :  { %v1066_v63 = vmul.f32 %v1600_v61, %v1064_v62 }
0x1542   :  { %1068 = vrot.lane.b32.xlu0 %v1066_v63, %s1632_s15 }
0x15b4   :  { %v1069_v1 = vpop.permute.xlu0 %1068 }
0x15b5   :  { %v1071_v2 = vadd.f32 %v1069_v1, %v1061_v0 }
0x15b7   :  { %1601 = vtanh.f32 %v1071_v2 }
0x15c1   :  { %v1602_v10 = vpop.eup %1601 }
0x15c2   :  { %1074 = vrot.lane.b32.xlu1 %v1602_v10, %s1632_s15 }
0x1634   :  { %v1075_v11 = vpop.permute.xlu1 %1074 }
0x1635   :  { %v1077_v12 = vmul.f32 %v1600_v61, %v1075_v11 }
0x1637   :  { %v1084_v14 = vrot.slane %v1077_v12, 7 }
0x1639   :  { %1085 = vrot.lane.b32.xlu0 %v1084_v14, %s1633_s6 }
0x16ab   :  { %v1086_v15 = vpop.permute.xlu0 %1085 }
0x16ac   :  { %1457 = vmatmul.mubr.msk.f32.vlgmr.msra.gmra.mrb[10].mxu0 %vm231_vm5, %v1086_v15 }
0x177f   :  { %v1155_v20 = vpop.f32.mrb[10].mxu0 }
0x1780   :  { %v1156_v21 = vadd.f32 %v1155_v20, %v1082_v17  ;;  %v1458_v22 = vpop.f32.mrb[11].mxu0 }
0x1782   :  { %v1162_v23 = vrot.slane %v1156_v21, %v1161_v13 }
0x1784   :  { %v1163_v24 = vmul.f32 %v1162_v23, %v140_v16 }
0x1786   :  { %v1164_v25 = vmul.f32 %v1163_v24, %v1163_v24 }
0x1788   :  { %v1166_v26 = vsel %vm1165_vm6, %v1164_v25, 0.0 }
0x1789   :  { %1167 = vadd.xlane.f32.xlu1 %v1166_v26 }
0x1816   :  { %v1168_v33 = vpop.xlane.xlu1 %1167 }
0x1817   :  { %v1169_v34 = vmax.f32 %v1168_v33, 1e-24 }
0x1819   :  { %1603 = vrsqrt.f32 %v1169_v34 }
0x1823   :  { %v1604_v35 = vpop.eup %1603 }
0x1824   :  { %v1171_v36 = vmul.f32 %v1604_v35, %v1163_v24 }
0x1826   :  { %1468 = vmatmul.mubr.msk.f32.vlgmr.msra.gmra.mrb[10].mxu1 %vm231_vm5, %v1171_v36 }
0x18f9   :  { %v1252_v37 = vpop.f32.mrb[10].mxu1 }
0x18fa   :  { %v1253_v38 = vadd.f32 %v1291_v6, %v1252_v37  ;;  %v1469_v39 = vpop.f32.mrb[11].mxu1 }
0x18fc   :  { %1256 = vst [vmem:[#allocation2] sm:$0x3] %v1253_v38 }
0x18fd   :  { %1616 = shalt.err (!%p1613_p4)
}
0x18fe   :  { %s1617_s15 = scalar_lea.hbm %s1909_s11, 32 }
0x18ff   :  { %p1618_p5 = scmp.ne.s32.totalorder %s1909_s11, %s1617_s15  ;;  %p1621_p6 = scmp.lt.u32.totalorder %s1617_s15, %s1909_s11 }
0x1901   :  { %p1623_p7 = pnand %p1621_p6, %p1618_p5 }
0x1903   :  { %1626 = shalt.err (!%p1623_p7)
}
0x1904   :  { %1266 = dma.vmem_to_hbm [thread:$0]  %s1264_s14, 32, %s1909_s11, [#allocation3]  }
0x1905   :  { %1627 = dma.done.wait [#allocation3], 32  }
0x1906   :  { %1628 = vsyncadd [#allocation3], 4294967264 }
0x1907   :  { %1270 = vsyncpa [#allocation3], 1 }

</bundles_post_ra>
